<compile_context>
chip_gen: v6e
topology: v6e:2x2x1
jax: 0.10.0
libtpu: 0.0.40
codegen_flags: <defaults>
</compile_context>

<pallas_src>
import functools

import jax
import jax.numpy as jnp
from jax.experimental import pallas as pl
from jax.experimental.pallas import tpu as pltpu


def _attn_classifier_kernel(
    x_ref,
    wa1_ref, ba1_ref,     # attn: Linear(concept_dim -> hidden_dim)
    wa2_ref, ba2_ref,     # attn: Linear(hidden_dim -> concept_dim)
    wm1_ref, bm1_ref,     # mlp:  Linear(concept_dim -> hidden_dim)
    wcat_ref, bcat_ref,   # fused epilogue: [wm2; ws] (H+C, K), bm2 + bs (1, K)
    out_ref,
):
    x = x_ref[...]                                                    # (TB, C)

    # attention branch: Linear -> Tanh -> Linear -> Sigmoid
    h = jnp.dot(x, wa1_ref[...], preferred_element_type=jnp.float32) + ba1_ref[...]
    h = jnp.tanh(h)
    a = jnp.dot(h, wa2_ref[...], preferred_element_type=jnp.float32) + ba2_ref[...]
    attn_weights = jax.nn.sigmoid(a)                                  # (TB, C)

    # gate the input
    xw = x * attn_weights                                             # (TB, C)

    # mlp hidden: Linear -> ReLU
    m = jnp.dot(xw, wm1_ref[...], preferred_element_type=jnp.float32) + bm1_ref[...]
    m = jnp.maximum(m, 0.0)                                           # (TB, H)

    # fused epilogue: mlp second Linear + shortcut Linear in one MXU dot
    #   [m | xw] @ [wm2 ; ws] + (bm2 + bs)
    cat = jnp.concatenate([m, xw], axis=-1)                           # (TB, H+C)
    out = jnp.dot(cat, wcat_ref[...], preferred_element_type=jnp.float32) + bcat_ref[...]

    out_ref[...] = out.astype(out_ref.dtype)                          # (TB, K)


def _round_up(x, m):
    return (x + m - 1) // m * m


@functools.partial(jax.jit, static_argnames=("block_batch",))
def attention_classifier_forward(x, params, *, block_batch=512):
    """Fused AttentionClassifier forward pass, tiled over the batch dimension.

    x: (batch, concept_dim) float32
    params: dict of pre-transposed weights / (1, out) biases (see layout note).
    """
    batch, concept_dim = x.shape
    hidden_dim = params["wa1"].shape[1]
    num_classes = params["wm2"].shape[1]

    # Fuse the epilogue weights once (trace-time; negligible cost).
    w_cat = jnp.concatenate([params["wm2"], params["ws"]], axis=0)    # (H+C, K)
    b_cat = params["bm2"] + params["bs"]                              # (1, K)

    # Batch tile: large multiple of 8 (sublane-aligned), capped by the batch.
    tb = min(int(block_batch), _round_up(batch, 8))
    padded_batch = _round_up(batch, tb)
    if padded_batch != batch:
        x = jnp.pad(x, ((0, padded_batch - batch), (0, 0)))
    grid = (padded_batch // tb,)

    # x / out stream per grid step; weights & biases get a constant block index
    # so Pallas keeps them resident in VMEM (no per-step DMA).
    x_spec = pl.BlockSpec((tb, concept_dim), lambda i: (i, 0))
    out_spec = pl.BlockSpec((tb, num_classes), lambda i: (i, 0))

    def resident(arr):
        return pl.BlockSpec(arr.shape, lambda i: (0, 0))

    weight_args = (
        params["wa1"], params["ba1"],
        params["wa2"], params["ba2"],
        params["wm1"], params["bm1"],
        w_cat, b_cat,
    )
    in_specs = [x_spec] + [resident(a) for a in weight_args]

    # Advisory cost hint for the XLA scheduler.
    c, h, k = concept_dim, hidden_dim, num_classes
    flops = 2 * padded_batch * (c * h + h * c + c * h + (h + c) * k)
    transcendentals = padded_batch * (h + c)                          # tanh + sigmoid
    weight_bytes = sum(int(a.size) * 4 for a in weight_args)
    bytes_accessed = 4 * padded_batch * (c + k) + weight_bytes

    out = pl.pallas_call(
        _attn_classifier_kernel,
        out_shape=jax.ShapeDtypeStruct((padded_batch, num_classes), jnp.float32),
        grid=grid,
        in_specs=in_specs,
        out_specs=out_spec,
        compiler_params=pltpu.CompilerParams(
            dimension_semantics=("parallel",),
        ),
        cost_estimate=pl.CostEstimate(
            flops=flops,
            transcendentals=transcendentals,
            bytes_accessed=bytes_accessed,
        ),
    )(x, *weight_args)

    return out[:batch]


def init_params(key, concept_dim, hidden_dim, num_classes):
    """Deterministic synthetic init (shapes match the nn.Linear layers).

    Weights stored as (in_features, out_features); biases as (1, out_features).
    """
    ks = jax.random.split(key, 10)

    def lin(kw, kb, fan_in, fan_out):
        bound = 1.0 / jnp.sqrt(fan_in)
        w = jax.random.uniform(kw, (fan_in, fan_out), jnp.float32, -bound, bound)
        b = jax.random.uniform(kb, (1, fan_out), jnp.float32, -bound, bound)
        return w, b

    wa1, ba1 = lin(ks[0], ks[1], concept_dim, hidden_dim)
    wa2, ba2 = lin(ks[2], ks[3], hidden_dim, concept_dim)
    wm1, bm1 = lin(ks[4], ks[5], concept_dim, hidden_dim)
    wm2, bm2 = lin(ks[6], ks[7], hidden_dim, num_classes)
    ws,  bs  = lin(ks[8], ks[9], concept_dim, num_classes)

    return dict(wa1=wa1, ba1=ba1, wa2=wa2, ba2=ba2,
                wm1=wm1, bm1=bm1, wm2=wm2, bm2=bm2,
                ws=ws, bs=bs)


def _reference_forward(x, p):
    """Pure-JAX reference mirroring the PyTorch forward exactly."""
    h = jnp.tanh(x @ p["wa1"] + p["ba1"])
    attn = jax.nn.sigmoid(h @ p["wa2"] + p["ba2"])
    xw = x * attn
    m = jnp.maximum(xw @ p["wm1"] + p["bm1"], 0.0)
    return (m @ p["wm2"] + p["bm2"]) + (xw @ p["ws"] + p["bs"])


if __name__ == "__main__":
    concept_dim, hidden_dim, num_classes = 16, 32, 4

    key = jax.random.PRNGKey(0)
    k_x1, k_x2, k_p = jax.random.split(key, 3)
    params = init_params(k_p, concept_dim, hidden_dim, num_classes)

    # Case 1: small batch (single grid step, exact tile).
    x1 = jax.random.normal(k_x1, (8, concept_dim), dtype=jnp.float32)
    out1 = jax.block_until_ready(attention_classifier_forward(x1, params))
    ref1 = _reference_forward(x1, params)
    assert out1.shape == (8, num_classes)
    assert jnp.allclose(out1, ref1, atol=1e-5, rtol=1e-5), "kernel mismatch (case 1)"

    # Case 2: batch not a multiple of the tile -> exercises grid + padding path.
    x2 = jax.random.normal(k_x2, (37, concept_dim), dtype=jnp.float32)
    out2 = jax.block_until_ready(
        attention_classifier_forward(x2, params, block_batch=16))
    ref2 = _reference_forward(x2, params)
    assert out2.shape == (37, num_classes)
    assert jnp.allclose(out2, ref2, atol=1e-5, rtol=1e-5), "kernel mismatch (case 2)"

    print("KERNEL_OK")
</pallas_src>

<mosaic_0001>
module attributes {stable_mosaic.version = 11 : i64} {
  func.func @_attn_classifier_kernel(%arg0: i32, %arg1: memref<8x16xf32, #tpu.memory_space<vmem>>, %arg2: memref<16x32xf32, #tpu.memory_space<vmem>>, %arg3: memref<1x32xf32, #tpu.memory_space<vmem>>, %arg4: memref<32x16xf32, #tpu.memory_space<vmem>>, %arg5: memref<1x16xf32, #tpu.memory_space<vmem>>, %arg6: memref<16x32xf32, #tpu.memory_space<vmem>>, %arg7: memref<1x32xf32, #tpu.memory_space<vmem>>, %arg8: memref<48x4xf32, #tpu.memory_space<vmem>>, %arg9: memref<1x4xf32, #tpu.memory_space<vmem>>, %arg10: memref<8x4xf32, #tpu.memory_space<vmem>>) attributes {dimension_semantics = [#tpu.dimension_semantics<parallel>], iteration_bounds = array<i64: 1>, scalar_prefetch = 0 : i64, scratch_operands = 0 : i64, tpu.core_type = #tpu.core_type<tc>, window_params = [{transform_indices = @transform_0, window_bounds = array<i64: 8, 16>}, {pipeline_mode = #tpu.pipeline_mode<synchronous>, transform_indices = @transform_1, window_bounds = array<i64: 16, 32>}, {pipeline_mode = #tpu.pipeline_mode<synchronous>, transform_indices = @transform_2, window_bounds = array<i64: 1, 32>}, {pipeline_mode = #tpu.pipeline_mode<synchronous>, transform_indices = @transform_3, window_bounds = array<i64: 32, 16>}, {pipeline_mode = #tpu.pipeline_mode<synchronous>, transform_indices = @transform_4, window_bounds = array<i64: 1, 16>}, {pipeline_mode = #tpu.pipeline_mode<synchronous>, transform_indices = @transform_5, window_bounds = array<i64: 16, 32>}, {pipeline_mode = #tpu.pipeline_mode<synchronous>, transform_indices = @transform_6, window_bounds = array<i64: 1, 32>}, {pipeline_mode = #tpu.pipeline_mode<synchronous>, transform_indices = @transform_7, window_bounds = array<i64: 48, 4>}, {pipeline_mode = #tpu.pipeline_mode<synchronous>, transform_indices = @transform_8, window_bounds = array<i64: 1, 4>}, {transform_indices = @transform_9, window_bounds = array<i64: 8, 4>}]} {
    %c0 = arith.constant 0 : index
    %c0_0 = arith.constant 0 : index
    %0 = vector.load %arg1[%c0, %c0_0] : memref<8x16xf32, #tpu.memory_space<vmem>>, vector<8x16xf32>
    %c0_1 = arith.constant 0 : index
    %c0_2 = arith.constant 0 : index
    %1 = vector.load %arg2[%c0_1, %c0_2] : memref<16x32xf32, #tpu.memory_space<vmem>>, vector<16x32xf32>
    %cst = arith.constant dense<0.000000e+00> : vector<8x32xf32>
    %2 = tpu.matmul %0, %1, %cst {dimension_numbers = #tpu.dot_dimension_numbers<[1], [0], [0], [1], [0, 0, 1, 1], [], []>} : vector<8x16xf32>, vector<16x32xf32>, vector<8x32xf32> -> vector<8x32xf32>
    %c0_3 = arith.constant 0 : index
    %c0_4 = arith.constant 0 : index
    %3 = vector.load %arg3[%c0_3, %c0_4] : memref<1x32xf32, #tpu.memory_space<vmem>>, vector<1x32xf32>
    %4 = vector.broadcast %3 : vector<1x32xf32> to vector<8x32xf32>
    %5 = arith.addf %2, %4 : vector<8x32xf32>
    %6 = math.tanh %5 : vector<8x32xf32>
    %c0_5 = arith.constant 0 : index
    %c0_6 = arith.constant 0 : index
    %7 = vector.load %arg4[%c0_5, %c0_6] : memref<32x16xf32, #tpu.memory_space<vmem>>, vector<32x16xf32>
    %cst_7 = arith.constant dense<0.000000e+00> : vector<8x16xf32>
    %8 = tpu.matmul %6, %7, %cst_7 {dimension_numbers = #tpu.dot_dimension_numbers<[1], [0], [0], [1], [0, 0, 1, 1], [], []>} : vector<8x32xf32>, vector<32x16xf32>, vector<8x16xf32> -> vector<8x16xf32>
    %c0_8 = arith.constant 0 : index
    %c0_9 = arith.constant 0 : index
    %9 = vector.load %arg5[%c0_8, %c0_9] : memref<1x16xf32, #tpu.memory_space<vmem>>, vector<1x16xf32>
    %10 = vector.broadcast %9 : vector<1x16xf32> to vector<8x16xf32>
    %11 = arith.addf %8, %10 : vector<8x16xf32>
    %12 = arith.negf %11 : vector<8x16xf32>
    %13 = math.exp %12 : vector<8x16xf32>
    %cst_10 = arith.constant 1.000000e+00 : f32
    %14 = vector.broadcast %cst_10 : f32 to vector<8x16xf32>
    %15 = arith.addf %14, %13 : vector<8x16xf32>
    %16 = arith.divf %14, %15 : vector<8x16xf32>
    %17 = arith.mulf %0, %16 : vector<8x16xf32>
    %c0_11 = arith.constant 0 : index
    %c0_12 = arith.constant 0 : index
    %18 = vector.load %arg6[%c0_11, %c0_12] : memref<16x32xf32, #tpu.memory_space<vmem>>, vector<16x32xf32>
    %cst_13 = arith.constant dense<0.000000e+00> : vector<8x32xf32>
    %19 = tpu.matmul %17, %18, %cst_13 {dimension_numbers = #tpu.dot_dimension_numbers<[1], [0], [0], [1], [0, 0, 1, 1], [], []>} : vector<8x16xf32>, vector<16x32xf32>, vector<8x32xf32> -> vector<8x32xf32>
    %c0_14 = arith.constant 0 : index
    %c0_15 = arith.constant 0 : index
    %20 = vector.load %arg7[%c0_14, %c0_15] : memref<1x32xf32, #tpu.memory_space<vmem>>, vector<1x32xf32>
    %21 = vector.broadcast %20 : vector<1x32xf32> to vector<8x32xf32>
    %22 = arith.addf %19, %21 : vector<8x32xf32>
    %cst_16 = arith.constant 0.000000e+00 : f32
    %23 = vector.broadcast %cst_16 : f32 to vector<8x32xf32>
    %24 = arith.maximumf %22, %23 : vector<8x32xf32>
    %25 = tpu.concatenate %24, %17 in 1 : vector<8x32xf32>, vector<8x16xf32> -> vector<8x48xf32>
    %c0_17 = arith.constant 0 : index
    %c0_18 = arith.constant 0 : index
    %26 = vector.load %arg8[%c0_17, %c0_18] : memref<48x4xf32, #tpu.memory_space<vmem>>, vector<48x4xf32>
    %cst_19 = arith.constant dense<0.000000e+00> : vector<8x4xf32>
    %27 = tpu.matmul %25, %26, %cst_19 {dimension_numbers = #tpu.dot_dimension_numbers<[1], [0], [0], [1], [0, 0, 1, 1], [], []>} : vector<8x48xf32>, vector<48x4xf32>, vector<8x4xf32> -> vector<8x4xf32>
    %c0_20 = arith.constant 0 : index
    %c0_21 = arith.constant 0 : index
    %28 = vector.load %arg9[%c0_20, %c0_21] : memref<1x4xf32, #tpu.memory_space<vmem>>, vector<1x4xf32>
    %29 = vector.broadcast %28 : vector<1x4xf32> to vector<8x4xf32>
    %30 = arith.addf %27, %29 : vector<8x4xf32>
    %c0_22 = arith.constant 0 : index
    %c0_23 = arith.constant 0 : index
    %31 = vector.load %arg10[%c0_22, %c0_23] : memref<8x4xf32, #tpu.memory_space<vmem>>, vector<8x4xf32>
    tpu.vector_store %arg10[%c0_22, %c0_23], %30 {strides = array<i32>} : memref<8x4xf32, #tpu.memory_space<vmem>>, vector<8x4xf32>,
    return
  }
  func.func @transform_0(%arg0: i32) -> (i32, i32) {
    %c0_i32 = arith.constant 0 : i32
    %c0_i32_0 = arith.constant 0 : i32
    return %arg0, %c0_i32 : i32, i32
  }
  func.func @transform_1(%arg0: i32) -> (i32, i32) {
    %c0_i32 = arith.constant 0 : i32
    %c0_i32_0 = arith.constant 0 : i32
    %c0_i32_1 = arith.constant 0 : i32
    return %c0_i32, %c0_i32_0 : i32, i32
  }
  func.func @transform_2(%arg0: i32) -> (i32, i32) {
    %c0_i32 = arith.constant 0 : i32
    %c0_i32_0 = arith.constant 0 : i32
    %c0_i32_1 = arith.constant 0 : i32
    return %c0_i32, %c0_i32_0 : i32, i32
  }
  func.func @transform_3(%arg0: i32) -> (i32, i32) {
    %c0_i32 = arith.constant 0 : i32
    %c0_i32_0 = arith.constant 0 : i32
    %c0_i32_1 = arith.constant 0 : i32
    return %c0_i32, %c0_i32_0 : i32, i32
  }
  func.func @transform_4(%arg0: i32) -> (i32, i32) {
    %c0_i32 = arith.constant 0 : i32
    %c0_i32_0 = arith.constant 0 : i32
    %c0_i32_1 = arith.constant 0 : i32
    return %c0_i32, %c0_i32_0 : i32, i32
  }
  func.func @transform_5(%arg0: i32) -> (i32, i32) {
    %c0_i32 = arith.constant 0 : i32
    %c0_i32_0 = arith.constant 0 : i32
    %c0_i32_1 = arith.constant 0 : i32
    return %c0_i32, %c0_i32_0 : i32, i32
  }
  func.func @transform_6(%arg0: i32) -> (i32, i32) {
    %c0_i32 = arith.constant 0 : i32
    %c0_i32_0 = arith.constant 0 : i32
    %c0_i32_1 = arith.constant 0 : i32
    return %c0_i32, %c0_i32_0 : i32, i32
  }
  func.func @transform_7(%arg0: i32) -> (i32, i32) {
    %c0_i32 = arith.constant 0 : i32
    %c0_i32_0 = arith.constant 0 : i32
    %c0_i32_1 = arith.constant 0 : i32
    return %c0_i32, %c0_i32_0 : i32, i32
  }
  func.func @transform_8(%arg0: i32) -> (i32, i32) {
    %c0_i32 = arith.constant 0 : i32
    %c0_i32_0 = arith.constant 0 : i32
    %c0_i32_1 = arith.constant 0 : i32
    return %c0_i32, %c0_i32_0 : i32, i32
  }
  func.func @transform_9(%arg0: i32) -> (i32, i32) {
    %c0_i32 = arith.constant 0 : i32
    %c0_i32_0 = arith.constant 0 : i32
    return %arg0, %c0_i32 : i32, i32
  }
}

</mosaic_0001>

<bundles_post_ra>
// kernel: attention_classifier_forward.1
= control target key start
LH: loop header
LB: loop body
LE: loop exit
PB: predicated region body
PF: predicated region fallthrough
CT: control target
= control target key end

     0   :  { %v465_v0 = vmov 0.0   ;;  %vm466_vm0 = vmmov 0   ;;  %vm42_vm1 = vcmask 130048   ;;  %vm128_vm2 = vcmask 261120   ;;  %s467_s28 = smov 32   ;;  %s604_s1 = inlined_call_operand.vmem [shape: f32[16,32], index: 1, kind: input, shape index: {}]   ;;  %s605_s0 = inlined_call_operand.vmem [shape: f32[8,16], index: 0, kind: input, shape index: {}]   ;;  %s606_s3 = inlined_call_operand.vmem [shape: f32[32,16], index: 3, kind: input, shape index: {}]   ;;  %s607_s2 = inlined_call_operand.vmem [shape: f32[1,32], index: 2, kind: input, shape index: {}]   ;;  %s608_s5 = inlined_call_operand.vmem [shape: f32[16,32], index: 5, kind: input, shape index: {}]   ;;  %s609_s4 = inlined_call_operand.vmem [shape: f32[1,16], index: 4, kind: input, shape index: {}]   ;;  %s610_s7 = inlined_call_operand.vmem [shape: f32[48,4], index: 7, kind: input, shape index: {}]   ;;  %s611_s6 = inlined_call_operand.vmem [shape: f32[1,32], index: 6, kind: input, shape index: {}]   ;;  %s612_s8 = inlined_call_operand.vmem [shape: f32[1,4], index: 8, kind: input, shape index: {}]   ;;  %s613_s9 = inlined_call_operand.vmem [shape: f32[8,4], index: 9, kind: output, shape index: {}]  }
   0x1   :  { %416 = vmatprep.subr.mxu1 %v465_v0  ;;  %v34_v1 = vld [vmem:[%s604_s1 + $0x8] sm:$0xff]  ;;  %v33_v2 = vld [vmem:[%s604_s1] sm:$0xff]  ;;  %420 = vmatprep.mubr.msk.f32.mxu1 %vm466_vm0, %v465_v0  ;;  %v120_v4 = vld [vmem:[%s606_s3 + $0x18] sm:$0xff]  ;;  %vm309_vm3 = vcmask 392192   ;;  %vm383_vm4 = vcmask 31744  }
   0x2   :  { %417 = vmatpush3.msra.mxu1 %v34_v1  ;;  %v32_v3 = vld [vmem:[%s605_s0] sm:$0xff]  ;;  %434 = vmatprep.subr.mxu0 %v465_v0  ;;  %v119_v5 = vld [vmem:[%s606_s3 + $0x10] sm:$0xff]  ;;  %v118_v6 = vld [vmem:[%s606_s3 + $0x8] sm:$0xff] }
   0x3   :  { %418 = vmatprep.subr.mxu1 %v465_v0  ;;  %438 = vmatprep.mubr.msk.f32.mxu0 %vm466_vm0, %v465_v0  ;;  %v117_v7 = vld [vmem:[%s606_s3] sm:$0xff]  ;;  %v210_v13 = vld [vmem:[%s608_s5 + $0x8] sm:$0xff]  ;;  %v299_v26 = vld [vmem:[%s610_s7 + $0x18] sm:$0xff] }
   0x4   :  { %419 = vmatpush3.msra.mxu1 %v33_v2  ;;  %v389_v8 = vld [vmem:[%s607_s2] ss:$0 sm:$0xff]  ;;  %435 = vmatpush3.msra.mxu0 %v210_v13  ;;  %v301_v24 = vld [vmem:[%s610_s7 + $0x28] sm:$0xff]  ;;  %v298_v27 = vld [vmem:[%s610_s7 + $0x10] sm:$0xff] }
   0x5   :  { %421 = vmatmul.mubr.msk.f32.vlgmr.msra.gmra.mxu1 %vm42_vm1, %v32_v3  ;;  %423 = vmatprep.subr.mxu1 %v465_v0  ;;  %v209_v14 = vld [vmem:[%s608_s5] sm:$0xff]  ;;  %v297_v28 = vld [vmem:[%s610_s7 + $0x8] sm:$0xff] }
   0x6   :  { %431 = vmatprep.mubr.msk.f32.mxu1 %vm466_vm0, %v465_v0  ;;  %424 = vmatpush3.msra.mxu1 %v120_v4  ;;  %v391_v15 = vld [vmem:[%s609_s4] ss:$0 sm:$0xff] }
   0x7   :  { %425 = vmatprep.subr.mxu1 %v465_v0  ;;  %436 = vmatprep.subr.mxu0 %v465_v0  ;;  %v300_v25 = vld [vmem:[%s610_s7 + $0x20] sm:$0xff] }
   0x8   :  { %426 = vmatpush3.msra.mxu1 %v119_v5  ;;  %437 = vmatpush3.msra.mxu0 %v209_v14  ;;  %v296_v29 = vld [vmem:[%s610_s7] sm:$0xff] }
   0x9   :  { %427 = vmatprep.subr.mxu1 %v465_v0  ;;  %441 = vmatprep.subr.mxu0 %v465_v0  ;;  %v394_v30 = vld [vmem:[%s611_s6] ss:$0 sm:$0xff] }
   0xa   :  { %428 = vmatpush3.msra.mxu1 %v118_v6  ;;  %v396_v37 = vld [vmem:[%s612_s8] ss:$0 sm:$0xff] }
   0xb   :  { %429 = vmatprep.subr.mxu1 %v465_v0 }
   0xc   :  { %430 = vmatpush3.msra.mxu1 %v117_v7 }
  0xc5   :  { %v112_v9 = vpop.f32.mrf.mxu1 }
  0xc6   :  { %v113_v10 = vadd.f32 %v389_v8, %v112_v9 }
  0xc7   :  { %v422_v11 = vpop.f32.mrf.mxu1 }
  0xc8   :  { %459 = vtanh.f32 %v113_v10 }
  0xd5   :  { %v460_v12 = vpop.eup %459 }
  0xd6   :  { %432 = vmatmul.mubr.msk.f32.vlgmr.msra.gmra.mxu1 %vm128_vm2, %v460_v12 }
 0x196   :  { %v198_v16 = vpop.f32.mrf.mxu1 }
 0x197   :  { %v199_v17 = vadd.f32 %v391_v15, %v198_v16 }
 0x198   :  { %v433_v18 = vpop.f32.mrf.mxu1 }
 0x199   :  { %v393_v19 = vmul.f32 -1.442695, %v199_v17 }
 0x19b   :  { %461 = vpow2.f32 %v393_v19 }
 0x1a8   :  { %v462_v20 = vpop.eup %461 }
 0x1a9   :  { %v205_v21 = vadd.f32 1.0, %v462_v20 }
 0x1ab   :  { %463 = vrcp.f32 %v205_v21 }
 0x1b8   :  { %v464_v22 = vpop.eup %463 }
 0x1b9   :  { %v208_v23 = vmul.f32 %v464_v22, %v32_v3 }
 0x1bb   :  { %439 = vmatmul.mubr.msk.f32.vlgmr.msra.gmra.mxu0 %vm42_vm1, %v208_v23  ;;  %292 = vrot.lane.b32.xlu0 %v208_v23, %s467_s28 }
 0x1bc   :  { %442 = vmatpush3.msra.mxu0 %v301_v24  ;;  %453 = vmatprep.mubr.msk.f32.mxu0 %vm466_vm0, %v465_v0 }
 0x1bd   :  { %443 = vmatprep.subr.mxu0 %v465_v0 }
 0x1be   :  { %444 = vmatpush3.msra.mxu0 %v300_v25 }
 0x1bf   :  { %445 = vmatprep.subr.mxu0 %v465_v0 }
 0x1c0   :  { %446 = vmatpush3.msra.mxu0 %v299_v26 }
 0x1c1   :  { %447 = vmatprep.subr.mxu0 %v465_v0 }
 0x1c2   :  { %448 = vmatpush3.msra.mxu0 %v298_v27 }
 0x1c3   :  { %449 = vmatprep.subr.mxu0 %v465_v0 }
 0x1c4   :  { %450 = vmatpush3.msra.mxu0 %v297_v28 }
 0x1c5   :  { %451 = vmatprep.subr.mxu0 %v465_v0 }
 0x1c6   :  { %452 = vmatpush3.msra.mxu0 %v296_v29 }
 0x22d   :  { %v293_v35 = vpop.permute.xlu0 %292 }
 0x27b   :  { %v287_v31 = vpop.f32.mrf.mxu0 }
 0x27c   :  { %v288_v32 = vadd.f32 %v394_v30, %v287_v31 }
 0x27d   :  { %v440_v33 = vpop.f32.mrf.mxu0 }
 0x27e   :  { %v291_v34 = vmax.f32 %v288_v32, 0.0 }
 0x280   :  { %v295_v36 = vsel %vm128_vm2, %v291_v34, %v293_v35 }
 0x281   :  { %454 = vmatmul.mubr.msk.f32.vlgmr.msra.gmra.mxu0 %vm309_vm3, %v295_v36 }
 0x341   :  { %v379_v38 = vpop.f32.mrf.mxu0 }
 0x342   :  { %v380_v39 = vadd.f32 %v396_v37, %v379_v38 }
 0x343   :  { %v455_v40 = vpop.f32.mrf.mxu0 }
 0x344   :  { %384 = vst.msk [vmem:[%s613_s9] sm:$0xff] %vm383_vm4, %v380_v39 }

</bundles_post_ra>
